<compile_context>
chip_gen: v7x
topology: tpu7x:2x2x1
jax: 0.10.0
libtpu: 0.0.40
codegen_flags: <defaults>
</compile_context>

<pallas_src>
import functools

import jax
import jax.numpy as jnp
from jax.experimental import pallas as pl
from jax.experimental.pallas import tpu as pltpu

HIDDEN = 64
P_DROP = 0.1
_INV_KEEP = 1.0 / (1.0 - P_DROP)
_DROP_THRESH = round(P_DROP * (2 ** 32))        # drop iff bits < thresh  (P=0.1)


def _hash_bits(idx_u32, salt_u32):
    """Murmur3-style finalizer: uniform uint32 bits from counter ^ salt (pure jnp)."""
    x = idx_u32 ^ salt_u32
    x = x ^ (x >> 16)
    x = x * jnp.uint32(0x7FEB352D)
    x = x ^ (x >> 15)
    x = x * jnp.uint32(0x846CA68B)
    x = x ^ (x >> 16)
    return x


def _host_salts(seed):
    """Two decorrelated 31-bit salts (one per dropout layer) derived from `seed`."""
    def fmix(v):
        v &= 0xFFFFFFFF
        v ^= v >> 16
        v = (v * 0x7FEB352D) & 0xFFFFFFFF
        v ^= v >> 15
        v = (v * 0x846CA68B) & 0xFFFFFFFF
        v ^= v >> 16
        return v
    s = int(seed) & 0xFFFFFFFF
    salt1 = fmix(s ^ 0x9E3779B9) & 0x7FFFFFFF
    salt2 = fmix(s ^ 0x6A09E667) & 0x7FFFFFFF
    return salt1, salt2


def mc_kernel(salts_ref,                                   # scalar prefetch (SMEM, int32[2])
              x_ref, w1_ref, b1_ref, w2_ref, b2_ref, w3_ref, b3_ref,
              o_ref):
    tn = x_ref.shape[1]

    salt1 = salts_ref[0].astype(jnp.uint32)
    salt2 = salts_ref[1].astype(jnp.uint32)
    thresh = jnp.uint32(_DROP_THRESH)

    # Grid-invariant per-element counters for this (64, tn) activation tile.
    rows = jax.lax.broadcasted_iota(jnp.int32, (HIDDEN, tn), 0)
    cols = jax.lax.broadcasted_iota(jnp.int32, (HIDDEN, tn), 1)
    gcol = cols + pl.program_id(0) * tn                     # global batch column
    elem = (gcol * HIDDEN + rows).astype(jnp.uint32)

    x = x_ref[...]                                          # (1, tn)

    # ---- fc1 + relu + dropout : K=1 contraction done as a VPU outer product ----
    h1 = w1_ref[...] * x + b1_ref[...]                      # (64,1)*(1,tn)+(64,1) -> (64,tn)
    h1 = jnp.maximum(h1, 0.0)
    keep1 = _hash_bits(elem, salt1) >= thresh
    h1 = jnp.where(keep1, h1, 0.0) * _INV_KEEP

    # ---- fc2 + relu + dropout : (64,64)@(64,tn) on the MXU, batch on lanes ----
    h2 = jnp.dot(w2_ref[...], h1, preferred_element_type=jnp.float32) + b2_ref[...]
    h2 = jnp.maximum(h2, 0.0)
    keep2 = _hash_bits(elem, salt2) >= thresh
    h2 = jnp.where(keep2, h2, 0.0) * _INV_KEEP

    # ---- out : (1,64)@(64,tn) -> lane-dense (1,tn); bias from SMEM scalar ----
    y = jnp.dot(w3_ref[...], h2, preferred_element_type=jnp.float32) + b3_ref[0]
    o_ref[...] = y.astype(o_ref.dtype)


def monte_carlo_forward(x, params, seed, *, tile_n=2048):
    """x: (N, 1) float32. Returns (N, 1) float32 (one MC-dropout forward pass)."""
    N, fin = x.shape
    assert fin == 1
    w1, b1, w2, b2, w3, b3 = params

    tile_n = min(tile_n, N)
    assert N % tile_n == 0, "N must be a multiple of tile_n"
    assert tile_n == N or tile_n % 128 == 0, "tile_n must be a multiple of 128"

    salts = jnp.asarray(_host_salts(seed), dtype=jnp.int32)
    xt = x.reshape(1, N)                                    # batch on the lane axis

    grid_spec = pltpu.PrefetchScalarGridSpec(
        num_scalar_prefetch=1,
        grid=(N // tile_n,),
        in_specs=[
            pl.BlockSpec((1, tile_n), lambda i, salts: (0, i)),       # x      (1, N)
            pl.BlockSpec((HIDDEN, 1), lambda i, salts: (0, 0)),       # W1     (64, 1)
            pl.BlockSpec((HIDDEN, 1), lambda i, salts: (0, 0)),       # b1     (64, 1)
            pl.BlockSpec((HIDDEN, HIDDEN), lambda i, salts: (0, 0)),  # W2     (64, 64)
            pl.BlockSpec((HIDDEN, 1), lambda i, salts: (0, 0)),       # b2     (64, 1)
            pl.BlockSpec((1, HIDDEN), lambda i, salts: (0, 0)),       # W3     (1, 64)
            pl.BlockSpec(memory_space=pltpu.MemorySpace.SMEM),        # b3     (1,) scalar
        ],
        out_specs=pl.BlockSpec((1, tile_n), lambda i, salts: (0, i)),
    )

    y = pl.pallas_call(
        mc_kernel,
        out_shape=jax.ShapeDtypeStruct((1, N), jnp.float32),
        grid_spec=grid_spec,
        compiler_params=pltpu.CompilerParams(
            dimension_semantics=("parallel",),   # independent tiles -> megacore on v7x
            vmem_limit_bytes=32 * 1024 * 1024,
        ),
    )(salts, xt, w1, b1, w2, b2, w3, b3)
    return y.reshape(N, 1)


def monte_carlo_reference(x, params, seed):
    """Pure-jnp reference using the identical counter-based dropout (validation)."""
    w1, b1, w2, b2, w3, b3 = params
    N = x.shape[0]
    salt1, salt2 = _host_salts(seed)
    thresh = jnp.uint32(_DROP_THRESH)

    rows = jax.lax.broadcasted_iota(jnp.int32, (HIDDEN, N), 0)
    cols = jax.lax.broadcasted_iota(jnp.int32, (HIDDEN, N), 1)
    elem = (cols * HIDDEN + rows).astype(jnp.uint32)
    keep1 = _hash_bits(elem, jnp.uint32(salt1)) >= thresh
    keep2 = _hash_bits(elem, jnp.uint32(salt2)) >= thresh

    dot = functools.partial(jnp.dot, precision=jax.lax.Precision.HIGHEST)
    xt = x.reshape(1, N)
    h1 = jnp.maximum(w1 * xt + b1, 0.0)
    h1 = jnp.where(keep1, h1, 0.0) * _INV_KEEP
    h2 = jnp.maximum(dot(w2, h1) + b2, 0.0)
    h2 = jnp.where(keep2, h2, 0.0) * _INV_KEEP
    y = dot(w3, h2) + b3[0]
    return y.reshape(N, 1)


def init_params(key):
    """nn.Linear-style init; weights kept in PyTorch orientation (out_f, in_f)."""
    k1, k2, k3, k4, k5, k6 = jax.random.split(key, 6)

    def unif(k, shape, fan_in):
        bound = 1.0 / (fan_in ** 0.5)
        return jax.random.uniform(k, shape, jnp.float32, -bound, bound)

    w1 = unif(k1, (HIDDEN, 1), 1)             # fc1.weight
    b1 = unif(k2, (HIDDEN, 1), 1)             # fc1.bias
    w2 = unif(k3, (HIDDEN, HIDDEN), HIDDEN)   # fc2.weight
    b2 = unif(k4, (HIDDEN, 1), HIDDEN)        # fc2.bias
    w3 = unif(k5, (1, HIDDEN), HIDDEN)        # out.weight
    b3 = unif(k6, (1,), HIDDEN)               # out.bias
    return (w1, b1, w2, b2, w3, b3)


if __name__ == "__main__":
    key = jax.random.PRNGKey(0)
    pkey, xkey = jax.random.split(key)
    params = init_params(pkey)

    N = 512                                   # small demo; tile_n=256 -> 2-step grid
    x = jax.random.normal(xkey, (N, 1), dtype=jnp.float32)

    y = monte_carlo_forward(x, params, seed=0, tile_n=256)
    jax.block_until_ready(y)
    assert y.shape == (N, 1) and y.dtype == jnp.float32

    y_ref = monte_carlo_reference(x, params, seed=0)
    assert jnp.allclose(y, y_ref, atol=1e-3, rtol=1e-3), float(
        jnp.max(jnp.abs(y - y_ref)))

    print("KERNEL_OK")
</pallas_src>

<mosaic_0001>
module attributes {stable_mosaic.version = 11 : i64} {
  func.func @mc_kernel(%arg0: i32, %arg1: memref<2xi32, #tpu.memory_space<smem>>, %arg2: memref<1x256xf32, #tpu.memory_space<vmem>>, %arg3: memref<64x1xf32, #tpu.memory_space<vmem>>, %arg4: memref<64x1xf32, #tpu.memory_space<vmem>>, %arg5: memref<64x64xf32, #tpu.memory_space<vmem>>, %arg6: memref<64x1xf32, #tpu.memory_space<vmem>>, %arg7: memref<1x64xf32, #tpu.memory_space<vmem>>, %arg8: memref<1xf32, #tpu.memory_space<smem>>, %arg9: memref<1x256xf32, #tpu.memory_space<vmem>>) attributes {dimension_semantics = [#tpu.dimension_semantics<parallel>], iteration_bounds = array<i64: 2>, scalar_prefetch = 1 : i64, scratch_operands = 0 : i64, tpu.core_type = #tpu.core_type<tc>, window_params = [{transform_indices = @transform_0, window_bounds = array<i64: 1, 256>}, {pipeline_mode = #tpu.pipeline_mode<synchronous>, transform_indices = @transform_1, window_bounds = array<i64: 64, 1>}, {pipeline_mode = #tpu.pipeline_mode<synchronous>, transform_indices = @transform_2, window_bounds = array<i64: 64, 1>}, {pipeline_mode = #tpu.pipeline_mode<synchronous>, transform_indices = @transform_3, window_bounds = array<i64: 64, 64>}, {pipeline_mode = #tpu.pipeline_mode<synchronous>, transform_indices = @transform_4, window_bounds = array<i64: 64, 1>}, {pipeline_mode = #tpu.pipeline_mode<synchronous>, transform_indices = @transform_5, window_bounds = array<i64: 1, 64>}, {transform_indices = @transform_6, window_bounds = array<i64: 1>}, {transform_indices = @transform_7, window_bounds = array<i64: 1, 256>}]} {
    %c0 = arith.constant 0 : index
    %0 = memref.load %arg1[%c0] : memref<2xi32, #tpu.memory_space<smem>>
    %c1 = arith.constant 1 : index
    %1 = memref.load %arg1[%c1] : memref<2xi32, #tpu.memory_space<smem>>
    %2 = tpu.iota {dimensions = array<i32: 0>} : vector<64x256xi32>
    %3 = tpu.iota {dimensions = array<i32: 1>} : vector<64x256xi32>
    %c256_i32 = arith.constant 256 : i32
    %4 = arith.muli %arg0, %c256_i32 : i32
    %5 = vector.broadcast %4 : i32 to vector<64x256xi32>
    %6 = arith.addi %3, %5 : vector<64x256xi32>
    %c64_i32 = arith.constant 64 : i32
    %7 = vector.broadcast %c64_i32 : i32 to vector<64x256xi32>
    %8 = arith.muli %6, %7 : vector<64x256xi32>
    %9 = arith.addi %8, %2 : vector<64x256xi32>
    %c0_0 = arith.constant 0 : index
    %c0_1 = arith.constant 0 : index
    %10 = vector.load %arg2[%c0_0, %c0_1] : memref<1x256xf32, #tpu.memory_space<vmem>>, vector<1x256xf32>
    %c0_2 = arith.constant 0 : index
    %c0_3 = arith.constant 0 : index
    %11 = vector.load %arg3[%c0_2, %c0_3] : memref<64x1xf32, #tpu.memory_space<vmem>>, vector<64x1xf32>
    %12 = vector.broadcast %11 : vector<64x1xf32> to vector<64x256xf32>
    %13 = vector.broadcast %10 : vector<1x256xf32> to vector<64x256xf32>
    %14 = arith.mulf %12, %13 : vector<64x256xf32>
    %c0_4 = arith.constant 0 : index
    %c0_5 = arith.constant 0 : index
    %15 = vector.load %arg4[%c0_4, %c0_5] : memref<64x1xf32, #tpu.memory_space<vmem>>, vector<64x1xf32>
    %16 = vector.broadcast %15 : vector<64x1xf32> to vector<64x256xf32>
    %17 = arith.addf %14, %16 : vector<64x256xf32>
    %cst = arith.constant 0.000000e+00 : f32
    %18 = vector.broadcast %cst : f32 to vector<64x256xf32>
    %19 = arith.maximumf %17, %18 : vector<64x256xf32>
    %20 = vector.broadcast %0 : i32 to vector<64x256xi32>
    %21 = arith.xori %9, %20 : vector<64x256xi32>
    %c16_i32 = arith.constant 16 : i32
    %22 = vector.broadcast %c16_i32 : i32 to vector<64x256xi32>
    %23 = arith.shrui %21, %22 : vector<64x256xi32>
    %24 = arith.xori %21, %23 : vector<64x256xi32>
    %c2146121005_i32 = arith.constant 2146121005 : i32
    %25 = vector.broadcast %c2146121005_i32 : i32 to vector<64x256xi32>
    %26 = arith.muli %24, %25 : vector<64x256xi32>
    %c15_i32 = arith.constant 15 : i32
    %27 = vector.broadcast %c15_i32 : i32 to vector<64x256xi32>
    %28 = arith.shrui %26, %27 : vector<64x256xi32>
    %29 = arith.xori %26, %28 : vector<64x256xi32>
    %c-2073254261_i32 = arith.constant -2073254261 : i32
    %30 = vector.broadcast %c-2073254261_i32 : i32 to vector<64x256xi32>
    %31 = arith.muli %29, %30 : vector<64x256xi32>
    %c16_i32_6 = arith.constant 16 : i32
    %32 = vector.broadcast %c16_i32_6 : i32 to vector<64x256xi32>
    %33 = arith.shrui %31, %32 : vector<64x256xi32>
    %34 = arith.xori %31, %33 : vector<64x256xi32>
    %c429496730_i32 = arith.constant 429496730 : i32
    %35 = vector.broadcast %c429496730_i32 : i32 to vector<64x256xi32>
    %36 = arith.cmpi uge, %34, %35 : vector<64x256xi32>
    %cst_7 = arith.constant 0.000000e+00 : f32
    %37 = vector.broadcast %cst_7 : f32 to vector<64x256xf32>
    %38 = arith.select %36, %19, %37 : vector<64x256xi1>, vector<64x256xf32>
    %cst_8 = arith.constant 1.11111116 : f32
    %39 = vector.broadcast %cst_8 : f32 to vector<64x256xf32>
    %40 = arith.mulf %38, %39 : vector<64x256xf32>
    %c0_9 = arith.constant 0 : index
    %c0_10 = arith.constant 0 : index
    %41 = vector.load %arg5[%c0_9, %c0_10] : memref<64x64xf32, #tpu.memory_space<vmem>>, vector<64x64xf32>
    %cst_11 = arith.constant dense<0.000000e+00> : vector<64x256xf32>
    %42 = tpu.matmul %41, %40, %cst_11 {dimension_numbers = #tpu.dot_dimension_numbers<[1], [0], [0], [1], [0, 0, 1, 1], [], []>} : vector<64x64xf32>, vector<64x256xf32>, vector<64x256xf32> -> vector<64x256xf32>
    %c0_12 = arith.constant 0 : index
    %c0_13 = arith.constant 0 : index
    %43 = vector.load %arg6[%c0_12, %c0_13] : memref<64x1xf32, #tpu.memory_space<vmem>>, vector<64x1xf32>
    %44 = vector.broadcast %43 : vector<64x1xf32> to vector<64x256xf32>
    %45 = arith.addf %42, %44 : vector<64x256xf32>
    %cst_14 = arith.constant 0.000000e+00 : f32
    %46 = vector.broadcast %cst_14 : f32 to vector<64x256xf32>
    %47 = arith.maximumf %45, %46 : vector<64x256xf32>
    %48 = vector.broadcast %1 : i32 to vector<64x256xi32>
    %49 = arith.xori %9, %48 : vector<64x256xi32>
    %c16_i32_15 = arith.constant 16 : i32
    %50 = vector.broadcast %c16_i32_15 : i32 to vector<64x256xi32>
    %51 = arith.shrui %49, %50 : vector<64x256xi32>
    %52 = arith.xori %49, %51 : vector<64x256xi32>
    %c2146121005_i32_16 = arith.constant 2146121005 : i32
    %53 = vector.broadcast %c2146121005_i32_16 : i32 to vector<64x256xi32>
    %54 = arith.muli %52, %53 : vector<64x256xi32>
    %c15_i32_17 = arith.constant 15 : i32
    %55 = vector.broadcast %c15_i32_17 : i32 to vector<64x256xi32>
    %56 = arith.shrui %54, %55 : vector<64x256xi32>
    %57 = arith.xori %54, %56 : vector<64x256xi32>
    %c-2073254261_i32_18 = arith.constant -2073254261 : i32
    %58 = vector.broadcast %c-2073254261_i32_18 : i32 to vector<64x256xi32>
    %59 = arith.muli %57, %58 : vector<64x256xi32>
    %c16_i32_19 = arith.constant 16 : i32
    %60 = vector.broadcast %c16_i32_19 : i32 to vector<64x256xi32>
    %61 = arith.shrui %59, %60 : vector<64x256xi32>
    %62 = arith.xori %59, %61 : vector<64x256xi32>
    %c429496730_i32_20 = arith.constant 429496730 : i32
    %63 = vector.broadcast %c429496730_i32_20 : i32 to vector<64x256xi32>
    %64 = arith.cmpi uge, %62, %63 : vector<64x256xi32>
    %cst_21 = arith.constant 0.000000e+00 : f32
    %65 = vector.broadcast %cst_21 : f32 to vector<64x256xf32>
    %66 = arith.select %64, %47, %65 : vector<64x256xi1>, vector<64x256xf32>
    %cst_22 = arith.constant 1.11111116 : f32
    %67 = vector.broadcast %cst_22 : f32 to vector<64x256xf32>
    %68 = arith.mulf %66, %67 : vector<64x256xf32>
    %c0_23 = arith.constant 0 : index
    %c0_24 = arith.constant 0 : index
    %69 = vector.load %arg7[%c0_23, %c0_24] : memref<1x64xf32, #tpu.memory_space<vmem>>, vector<1x64xf32>
    %cst_25 = arith.constant dense<0.000000e+00> : vector<1x256xf32>
    %70 = tpu.matmul %69, %68, %cst_25 {dimension_numbers = #tpu.dot_dimension_numbers<[1], [0], [0], [1], [0, 0, 1, 1], [], []>} : vector<1x64xf32>, vector<64x256xf32>, vector<1x256xf32> -> vector<1x256xf32>
    %c0_26 = arith.constant 0 : index
    %71 = memref.load %arg8[%c0_26] : memref<1xf32, #tpu.memory_space<smem>>
    %72 = vector.broadcast %71 : f32 to vector<1x256xf32>
    %73 = arith.addf %70, %72 : vector<1x256xf32>
    %c0_27 = arith.constant 0 : index
    %c0_28 = arith.constant 0 : index
    %74 = vector.load %arg9[%c0_27, %c0_28] : memref<1x256xf32, #tpu.memory_space<vmem>>, vector<1x256xf32>
    tpu.vector_store %arg9[%c0_27, %c0_28], %73 {strides = array<i32>} : memref<1x256xf32, #tpu.memory_space<vmem>>, vector<1x256xf32>,
    return
  }
  func.func @transform_0(%arg0: i32, %arg1: memref<2xi32, #tpu.memory_space<smem>>) -> (i32, i32) {
    %c0_i32 = arith.constant 0 : i32
    %c0_i32_0 = arith.constant 0 : i32
    return %c0_i32, %arg0 : i32, i32
  }
  func.func @transform_1(%arg0: i32, %arg1: memref<2xi32, #tpu.memory_space<smem>>) -> (i32, i32) {
    %c0_i32 = arith.constant 0 : i32
    %c0_i32_0 = arith.constant 0 : i32
    %c0_i32_1 = arith.constant 0 : i32
    return %c0_i32, %c0_i32_0 : i32, i32
  }
  func.func @transform_2(%arg0: i32, %arg1: memref<2xi32, #tpu.memory_space<smem>>) -> (i32, i32) {
    %c0_i32 = arith.constant 0 : i32
    %c0_i32_0 = arith.constant 0 : i32
    %c0_i32_1 = arith.constant 0 : i32
    return %c0_i32, %c0_i32_0 : i32, i32
  }
  func.func @transform_3(%arg0: i32, %arg1: memref<2xi32, #tpu.memory_space<smem>>) -> (i32, i32) {
    %c0_i32 = arith.constant 0 : i32
    %c0_i32_0 = arith.constant 0 : i32
    %c0_i32_1 = arith.constant 0 : i32
    return %c0_i32, %c0_i32_0 : i32, i32
  }
  func.func @transform_4(%arg0: i32, %arg1: memref<2xi32, #tpu.memory_space<smem>>) -> (i32, i32) {
    %c0_i32 = arith.constant 0 : i32
    %c0_i32_0 = arith.constant 0 : i32
    %c0_i32_1 = arith.constant 0 : i32
    return %c0_i32, %c0_i32_0 : i32, i32
  }
  func.func @transform_5(%arg0: i32, %arg1: memref<2xi32, #tpu.memory_space<smem>>) -> (i32, i32) {
    %c0_i32 = arith.constant 0 : i32
    %c0_i32_0 = arith.constant 0 : i32
    %c0_i32_1 = arith.constant 0 : i32
    return %c0_i32, %c0_i32_0 : i32, i32
  }
  func.func @transform_6(%arg0: i32, %arg1: memref<2xi32, #tpu.memory_space<smem>>) -> i32 {
    %c0_i32 = arith.constant 0 : i32
    %c0_i32_0 = arith.constant 0 : i32
    return %c0_i32 : i32
  }
  func.func @transform_7(%arg0: i32, %arg1: memref<2xi32, #tpu.memory_space<smem>>) -> (i32, i32) {
    %c0_i32 = arith.constant 0 : i32
    %c0_i32_0 = arith.constant 0 : i32
    return %c0_i32, %arg0 : i32, i32
  }
}

</mosaic_0001>

<bundles_post_ra>
// kernel: tpu_custom_call.1
= control target key start
LH: loop header
LB: loop body
LE: loop exit
PB: predicated region body
PF: predicated region fallthrough
CT: control target
= control target key end

     0   :  { %s1975_s0 = inlined_call_operand.vmem [shape: s32[2], index: 0, kind: input, shape index: {}]   ;;  %s1976_s1 = inlined_call_operand.vmem [shape: f32[1,512], index: 1, kind: input, shape index: {}]   ;;  %s1977_s2 = inlined_call_operand.vmem [shape: f32[64,1], index: 2, kind: input, shape index: {}]   ;;  %s1978_s3 = inlined_call_operand.vmem [shape: f32[64,1], index: 3, kind: input, shape index: {}]   ;;  %s1979_s4 = inlined_call_operand.vmem [shape: f32[64,64], index: 4, kind: input, shape index: {}]   ;;  %s1980_s5 = inlined_call_operand.vmem [shape: f32[64,1], index: 5, kind: input, shape index: {}]   ;;  %s1981_s6 = inlined_call_operand.vmem [shape: f32[1,64], index: 6, kind: input, shape index: {}]   ;;  %s1982_s7 = inlined_call_operand.<no memory space> [shape: f32[1], index: 7, kind: input, shape index: {}]   ;;  %s1983_s8 = inlined_call_operand.hbm [shape: f32[1,512], index: 8, kind: output, shape index: {}]  }
   0x1   :  { %s13_s29 = sshll.u32 %s1975_s0, 4  ;;  %17 = sst [smem:[#allocation4]] %s1982_s7  ;;  %s14_s29 = int_to_ptr.vmem [resolvable:$true] %s13_s29 }
   0x2   :  { %s1344_s10 = scalar_lea.vmem %s14_s29, 16  ;;  %p1349_p1 = scmp.lt.s32.totalorder %s14_s29, %s14_s29 }
   0x3   :  { %p1345_p0 = scmp.ne.s32.totalorder %s14_s29, %s1344_s10  ;;  %p1350_p2 = scmp.lt.s32.totalorder %s1344_s10, %s1344_s10 }
   0x5   :  { %p1351_p3 = por %p1350_p2, %p1349_p1 }
   0x7   :  { %p1352_p4 = pnand %p1351_p3, %p1345_p0 }
   0x9   :  { %1355 = shalt.err (!%p1352_p4)  }
   0xa   :  { %s1422_s11 = smov [#allocation3]  }
   0xb   :  { %16 = dma.vmem_to_smem %s14_s29, 16, %s1422_s11, [#allocation2] }
   0xc   :  { %1400 = dma.done.wait [#allocation2], 16 }
   0xd   :  { %1401 = vsyncadd [#allocation2], 4294967280 }
   0xe   :  { %19 = sfence }
   0xf   :  { %20 = vsyncpa [#allocation6], 0 }
  0x10   :  { %22 = vsyncpa [#allocation6 + $0x1], 0  ;;  %s1478_s0 = smov 0   ;;  %s1480_s12 = smov 0  }
  0x11   :  { %s1482_s7 = smov 0   ;;  %s1484_s13 = smov 0  }
  0x12 LB: > { %s1499_s14 = sadd.s32 4294967295, %s1420_s13   ;;  %s1244_s15 = sadd.s32 4294967294, %s1420_s13   ;;  %s1420_s13 = sphi %s1484_s13, %s1991_s13   ;;  %s1416_s7 = sphi %s1482_s7, %s1990_s7   ;;  %s1412_s12 = sphi %s1480_s12, %s1989_s12   ;;  %s1408_s0 = sphi %s1478_s0, %s1988_s0  }
  0x13   : > { %s1503_s16 = sadd.s32 1, %s1420_s13   ;;  %s187_s17 = sadd.s32 1, %s1416_s7 }
  0x14   : > { %s184_s18 = ssub.s32 %s1420_s13, %s1503_s16  ;;  %p197_p5 = scmp.ne.s32.totalorder %s1416_s7, %s1412_s12 }
  0x15   : > { %p185_p6 = scmp.eq.s32.totalorder %s184_s18, 0  ;;  %p198_p7 = scmp.eq.s32.totalorder %s1499_s14, 1 }
  0x16   : > { %p203_p8 = scmp.ne.s32.totalorder %s1412_s12, %s1408_s0  ;;  %p204_p9 = scmp.eq.s32.totalorder %s1244_s15, 1 }
  0x17   : > { %s1514_s19 = scalar_select %p185_p6, %s1416_s7, %s187_s17  }
  0x18   : > { %p1516_p10 = por %p198_p7, %p197_p5  ;;  %p1520_p11 = por %p204_p9, %p203_p8 }
  0x19   : > { %p1247_p12 = scmp.ge.s32.totalorder %s1420_s13, 1  ;;  %p248_p13 = scmp.lt.s32.totalorder %s1420_s13, 3 }
  0x1b   : > { %p249_p0 = pnand %p1247_p12, %p248_p13 }
  0x1c   : > { %v397_v0 = vld [vmem:[%s1978_s3] sm:$0xff] (!%p249_p0)  ;;  %v1423_v2 = vmov (!%p249_p0), 0   ;;  %v398_v3 = vld [vmem:[%s1978_s3 + $0x8] sm:$0xff] (!%p249_p0)  ;;  %v325_v5 = vld [vmem:[%s1977_s2 + $0x18] sm:$0xff] (!%p249_p0)  ;;  %v1424_v25 = vmov (!%p249_p0), 0.0   ;;  %v1984_v26 = vlaneseq (!%p249_p0)  ;;  %s1251_s25 = sshll.u32 (!%p249_p0), %s1499_s14, 8 }
  0x1d   : > { %252 = sbr.rel (%p249_p0) target bundleno = 689 (0x2b1), region = 48  ;;  %v322_v1 = vld [vmem:[%s1977_s2] sm:$0xff] (!%p249_p0)  ;;  %1343 = vset.pattern.permute.xlu1 (!%p249_p0), %v1423_v2  ;;  %1342 = vset.pattern.permute.xlu0 (!%p249_p0), %v1423_v2  ;;  %v323_v4 = vld [vmem:[%s1977_s2 + $0x8] sm:$0xff] (!%p249_p0)  ;;  %v324_v6 = vld [vmem:[%s1977_s2 + $0x10] sm:$0xff] (!%p249_p0)  ;;  %v300_v29 = vstv (!%p249_p0), %s1251_s25  ;;  %s285_s26 = sld [smem:[#allocation3]] (!%p249_p0) }
  0x1e   : > { %407 = vperm.xlu1 (!%p249_p0), %1343, %v397_v0   ;;  %332 = vperm.xlu0 (!%p249_p0), %1342, %v322_v1   ;;  %v400_v7 = vld [vmem:[%s1978_s3 + $0x18] sm:$0xff] (!%p249_p0)  ;;  %v399_v8 = vld [vmem:[%s1978_s3 + $0x10] sm:$0xff] (!%p249_p0)  ;;  %v327_v9 = vld [vmem:[%s1977_s2 + $0x28] sm:$0xff] (!%p249_p0)  ;;  %v297_v27 = vand.u32 (!%p249_p0), 127, %v1984_v26  ;;  %v1603_v31 = vshrl.u32 (!%p249_p0), %v1984_v26, 7  ;;  %s1249_s27 = sshll.u32 (!%p249_p0), %s1499_s14, 1 }
  0x1f   : > { %v326_v10 = vld [vmem:[%s1977_s2 + $0x20] sm:$0xff] (!%p249_p0)  ;;  %v402_v11 = vld [vmem:[%s1978_s3 + $0x28] sm:$0xff] (!%p249_p0)  ;;  %v329_v13 = vld [vmem:[%s1977_s2 + $0x38] sm:$0xff] (!%p249_p0)  ;;  %815 = vmatprep.mubr.f32.mxu0 (!%p249_p0), %v1424_v25  ;;  %1143 = vmatprep.mubr.f32.mxu1 (!%p249_p0), %v1424_v25  ;;  %p280_p1 = scmp.lt.s32.totalorder (!%p249_p0), %s1249_s27, 3  ;;  %s1250_s10 = sld [smem:[#allocation3 + $0x1]] (!%p249_p0) }
  0x20   : > { %v401_v12 = vld [vmem:[%s1978_s3 + $0x20] sm:$0xff] (!%p249_p0)  ;;  %v328_v14 = vld [vmem:[%s1977_s2 + $0x30] sm:$0xff] (!%p249_p0)  ;;  %v404_v15 = vld [vmem:[%s1978_s3 + $0x38] sm:$0xff] (!%p249_p0)  ;;  %v298_v28 = vadd.s32 (!%p249_p0), 128, %v297_v27  ;;  %v301_v32 = vadd.s32 (!%p249_p0), %v300_v29, %v297_v27  ;;  %v291_v33 = vadd.s32 (!%p249_p0), 24, %v1603_v31  ;;  %v290_v34 = vadd.s32 (!%p249_p0), 16, %v1603_v31 }
  0x21   : > { %v403_v16 = vld [vmem:[%s1978_s3 + $0x30] sm:$0xff] (!%p249_p0)  ;;  %v679_v17 = vld [vmem:[%s1980_s5 + $0x8] sm:$0xff] (!%p249_p0)  ;;  %v678_v18 = vld [vmem:[%s1980_s5] sm:$0xff] (!%p249_p0)  ;;  %v289_v39 = vadd.s32 (!%p249_p0), 8, %v1603_v31  ;;  %v293_v52 = vadd.s32 (!%p249_p0), 40, %v1603_v31  ;;  %v292_v63 = vadd.s32 (!%p249_p0), 32, %v1603_v31 }
  0x22   : > { %412 = vperm.xlu1 (!%p249_p0), %1343, %v398_v3   ;;  %337 = vperm.xlu0 (!%p249_p0), %1342, %v323_v4   ;;  %v681_v19 = vld [vmem:[%s1980_s5 + $0x18] sm:$0xff] (!%p249_p0)  ;;  %v680_v20 = vld [vmem:[%s1980_s5 + $0x10] sm:$0xff] (!%p249_p0)  ;;  %v683_v21 = vld [vmem:[%s1980_s5 + $0x28] sm:$0xff] (!%p249_p0)  ;;  %v302_v30 = vadd.s32 (!%p249_p0), %v300_v29, %v298_v28  ;;  %v1609_v36 = vmul.u32 (!%p249_p0), 64, %v301_v32  ;;  %v373_v3 = vsub.s32 (!%p249_p0), 0, %v1603_v31  ;;  %s1074_s17 = sld [smem:[#allocation4]] (!%p249_p0) }
  0x23   : > { %v682_v22 = vld [vmem:[%s1980_s5 + $0x20] sm:$0xff] (!%p249_p0)  ;;  %v685_v23 = vld [vmem:[%s1980_s5 + $0x38] sm:$0xff] (!%p249_p0)  ;;  %v684_v24 = vld [vmem:[%s1980_s5 + $0x30] sm:$0xff] (!%p249_p0)  ;;  %v1626_v42 = vstv (!%p249_p0), %s285_s26  ;;  %s276_s18 = sand.u32 (!%p249_p0), 1, %s1412_s12   ;;  %s1266_s23 = sshll.u32 (!%p249_p0), %s1499_s14, 5 }
  0x24   : > { %v1607_v35 = vmul.u32 64, %v302_v30  ;;  %v1613_v37 = vadd.s32 %v1609_v36, %v291_v33  ;;  %v1616_v38 = vadd.s32 %v1609_v36, %v290_v34  ;;  %v1642_v48 = vadd.s32 %v1609_v36, %v1603_v31  ;;  %s1993_s27 = smov (!%p280_p1, %s1249_s27), 3  ;;  %s1248_s22 = sshll.u32 %s276_s18, 1 }
  0x25   : > { %v1645_v49 = vadd.s32 %v1609_v36, %v289_v39  ;;  %v1659_v61 = vadd.s32 %v1609_v36, %v293_v52  ;;  %s282_s30 = scalar_lea.vmem %s1976_s1, %s1993_s27  ;;  %s278_s24 = scalar_lea.vmem [#allocation5], %s1248_s22 }
  0x26   : > { %347 = vperm.xlu1 %1343, %v325_v5   ;;  %342 = vperm.xlu0 %1342, %v324_v6   ;;  %v1621_v40 = vadd.s32 %v1607_v35, %v1603_v31  ;;  %v1624_v41 = vadd.s32 %v1607_v35, %v291_v33  ;;  %v1629_v43 = vadd.s32 %v1607_v35, %v290_v34  ;;  %s1188_s25 = sshll.u32 %s278_s24, 4  ;;  %s1933_s28 = scalar_lea.hbm %s1983_s8, %s1266_s23  ;;  %s1935_s25 = int_to_ptr.vmem [resolvable:$true] %s1188_s25 }
  0x27   : > { %v484_v44 = vxor.u32 %v1626_v42, %v1613_v37  ;;  %v482_v45 = vxor.u32 %v1626_v42, %v1616_v38  ;;  %v1636_v46 = vadd.s32 %v1607_v35, %v289_v39  ;;  %v478_v57 = vxor.u32 %v1626_v42, %v1642_v48  ;;  %s1174_s29 = scalar_lea.sflag [#allocation6], %s276_s18  ;;  %s1426_s14 = smov [#allocation5]  }
  0x28   : > { %v479_v47 = vxor.u32 %v1626_v42, %v1621_v40  ;;  %v485_v50 = vxor.u32 %v1626_v42, %v1624_v41  ;;  %v483_v51 = vxor.u32 %v1626_v42, %v1629_v43  ;;  %v480_v58 = vxor.u32 %v1626_v42, %v1645_v49  ;;  %s1360_s9 = sshll.u32 %s1426_s14, 4  ;;  %s1361_s9 = int_to_ptr.vmem [resolvable:$false] %s1360_s9 }
  0x29   : > { %v500_v53 = vshrl.u32 %v484_v44, 16  ;;  %v498_v54 = vshrl.u32 %v482_v45, 16  ;;  %v481_v55 = vxor.u32 %v1626_v42, %v1636_v46  ;;  %v1662_v62 = vadd.s32 %v1607_v35, %v293_v52  ;;  %p1363_p5 = scmp.lt.s32.totalorder %s1935_s25, %s1361_s9 }
  0x2a   : > { %422 = vperm.xlu1 %1343, %v400_v7   ;;  %417 = vperm.xlu0 %1342, %v399_v8   ;;  %v495_v56 = vshrl.u32 %v479_v47, 16  ;;  %v501_v59 = vshrl.u32 %v485_v50, 16  ;;  %v499_v60 = vshrl.u32 %v483_v51, 16  ;;  %v494_v5 = vshrl.u32 %v478_v57, 16  ;;  %v321_v7 = vld [vmem:[%s282_s30] sm:$0x3] }
  0x2b   : > { %v516_v0 = vxor.u32 %v500_v53, %v484_v44  ;;  %v514_v1 = vxor.u32 %v498_v54, %v482_v45  ;;  %v497_v2 = vshrl.u32 %v481_v55, 16  ;;  %v496_v6 = vshrl.u32 %v480_v58, 16  ;;  %s1356_s30 = scalar_lea.vmem %s1935_s25, 32 }
  0x2c   : > { %v511_v4 = vxor.u32 %v495_v56, %v479_v47  ;;  %v517_v8 = vxor.u32 %v501_v59, %v485_v50  ;;  %v294_v45 = vadd.s32 48, %v1603_v31  ;;  %p1357_p2 = scmp.ne.s32.totalorder %s1935_s25, %s1356_s30 }
  0x2e   : > { %357 = vperm.xlu1 %1343, %v327_v9   ;;  %352 = vperm.xlu0 %1342, %v326_v10   ;;  %v515_v9 = vxor.u32 %v499_v60, %v483_v51  ;;  %v488_v10 = vxor.u32 %v1626_v42, %v1659_v61  ;;  %p1358_p3 = pnand %p1357_p2, %p1516_p10 }
  0x30   : > { %v504_v27 = vshrl.u32 %v488_v10, 16  ;;  %p1359_p4 = pneg %p1358_p3 }
  0x32   : > { %432 = vperm.xlu1 %1343, %v402_v11   ;;  %427 = vperm.xlu0 %1342, %v401_v12   ;;  %v489_v11 = vxor.u32 %v1626_v42, %v1662_v62  ;;  %v1674_v12 = vadd.s32 %v1609_v36, %v292_v63 }
  0x34   : > { %v505_v28 = vshrl.u32 %v489_v11, 16  ;;  %v486_v29 = vxor.u32 %v1626_v42, %v1674_v12 }
  0x36   : > { %367 = vperm.xlu1 %1343, %v329_v13   ;;  %362 = vperm.xlu0 %1342, %v328_v14   ;;  %v1677_v13 = vadd.s32 %v1607_v35, %v292_v63  ;;  %v295_v14 = vadd.s32 56, %v1603_v31  ;;  %v521_v56 = vxor.u32 %v505_v28, %v489_v11 }
  0x38   : > { %v487_v30 = vxor.u32 %v1626_v42, %v1677_v13  ;;  %v1688_v32 = vadd.s32 %v1609_v36, %v295_v14  ;;  %v1691_v33 = vadd.s32 %v1607_v35, %v295_v14 }
  0x3a   : > { %442 = vperm.xlu1 %1343, %v404_v15   ;;  %437 = vperm.xlu0 %1342, %v403_v16   ;;  %v377_v15 = vsub.s32 1, %v1603_v31  ;;  %v532_v16 = vmul.u32 2146121005, %v516_v0  ;;  %v492_v59 = vxor.u32 %v1626_v42, %v1688_v32  ;;  %v493_v60 = vxor.u32 %v1626_v42, %v1691_v33 }
  0x3c   : > { %v548_v34 = vshrl.u32 %v532_v16, 15  ;;  %v1694_v47 = vrot.slane %v321_v7, %v377_v15  ;;  %v508_v15 = vshrl.u32 %v492_v59, 16 }
  0x3e   : > { %693 = vperm.xlu1 %1343, %v679_v17   ;;  %688 = vperm.xlu0 %1342, %v678_v18   ;;  %v530_v17 = vmul.u32 2146121005, %v514_v1  ;;  %v513_v18 = vxor.u32 %v497_v2, %v481_v55  ;;  %v520_v55 = vxor.u32 %v504_v27, %v488_v10  ;;  %v564_v63 = vxor.u32 %v548_v34, %v532_v16 }
  0x3f   : > { %v1701_v2 = vadd.s32 %v1609_v36, %v294_v45  ;;  %v537_v10 = vmul.u32 2146121005, %v521_v56 }
  0x40   : > { %v546_v39 = vshrl.u32 %v530_v17, 15  ;;  %v529_v44 = vmul.u32 2146121005, %v513_v18  ;;  %v509_v18 = vshrl.u32 %v493_v60, 16  ;;  %v580_v16 = vmul.u32 2221713035, %v564_v63 }
  0x41   : > { %v490_v36 = vxor.u32 %v1626_v42, %v1701_v2  ;;  %v553_v34 = vshrl.u32 %v537_v10, 15 }
  0x42   : > { %703 = vperm.xlu1 %1343, %v681_v19   ;;  %698 = vperm.xlu0 %1342, %v680_v20   ;;  %v1681_v19 = vrot.slane %v321_v7, %v373_v3  ;;  %v527_v20 = vmul.u32 2146121005, %v511_v4  ;;  %v562_v0 = vxor.u32 %v546_v39, %v530_v17  ;;  %v545_v1 = vshrl.u32 %v529_v44, 15 }
  0x43   : > { %v524_v39 = vxor.u32 %v508_v15, %v492_v59 }
  0x44   : > { %v543_v50 = vshrl.u32 %v527_v20, 15  ;;  %v578_v17 = vmul.u32 2221713035, %v562_v0 }
  0x46   : > { %713 = vperm.xlu1 %1343, %v683_v21   ;;  %708 = vperm.xlu0 %1342, %v682_v22   ;;  %v510_v21 = vxor.u32 %v494_v5, %v478_v57  ;;  %v512_v22 = vxor.u32 %v496_v6, %v480_v58  ;;  %v502_v57 = vshrl.u32 %v486_v29, 16  ;;  %v503_v58 = vshrl.u32 %v487_v30, 16 }
  0x47   : > { %v559_v3 = vxor.u32 %v543_v50, %v527_v20  ;;  %v1704_v6 = vadd.s32 %v1607_v35, %v294_v45  ;;  %v525_v45 = vxor.u32 %v509_v18, %v493_v60  ;;  %v596_v50 = vshrl.u32 %v580_v16, 16 }
  0x48   : > { %v526_v51 = vmul.u32 2146121005, %v510_v21  ;;  %v528_v52 = vmul.u32 2146121005, %v512_v22  ;;  %v518_v11 = vxor.u32 %v502_v57, %v486_v29  ;;  %v519_v14 = vxor.u32 %v503_v58, %v487_v30 }
  0x49   : > { %v561_v21 = vxor.u32 %v545_v1, %v529_v44  ;;  %v575_v20 = vmul.u32 2221713035, %v559_v3  ;;  %v491_v35 = vxor.u32 %v1626_v42, %v1704_v6  ;;  %v569_v42 = vxor.u32 %v553_v34, %v537_v10 }
  0x4a   : > { %723 = vperm.xlu1 %1343, %v685_v23   ;;  %718 = vperm.xlu0 %1342, %v684_v24   ;;  %v533_v23 = vmul.u32 2146121005, %v517_v8  ;;  %v531_v24 = vmul.u32 2146121005, %v515_v9  ;;  %v542_v4 = vshrl.u32 %v526_v51, 15  ;;  %v544_v5 = vshrl.u32 %v528_v52, 15 }
  0x4b   : > { %v536_v9 = vmul.u32 2146121005, %v520_v55  ;;  %v534_v29 = vmul.u32 2146121005, %v518_v11  ;;  %v591_v55 = vshrl.u32 %v575_v20, 16 }
  0x4c   : > { %v549_v53 = vshrl.u32 %v533_v23, 15  ;;  %v547_v54 = vshrl.u32 %v531_v24, 15  ;;  %v558_v22 = vxor.u32 %v542_v4, %v526_v51  ;;  %v560_v27 = vxor.u32 %v544_v5, %v528_v52 }
  0x4d   : > { %v552_v28 = vshrl.u32 %v536_v9, 15  ;;  %v535_v30 = vmul.u32 2146121005, %v519_v14  ;;  %v577_v44 = vmul.u32 2221713035, %v561_v21  ;;  %v507_v51 = vshrl.u32 %v491_v35, 16 }
  0x4e   : > { %v565_v7 = vxor.u32 %v549_v53, %v533_v23  ;;  %v563_v8 = vxor.u32 %v547_v54, %v531_v24  ;;  %v594_v53 = vshrl.u32 %v578_v17, 16  ;;  %v506_v54 = vshrl.u32 %v490_v36, 16 }
  0x4f   : > { %v574_v56 = vmul.u32 2221713035, %v558_v22  ;;  %v576_v57 = vmul.u32 2221713035, %v560_v27  ;;  %v568_v63 = vxor.u32 %v552_v28, %v536_v9  ;;  %v550_v0 = vshrl.u32 %v534_v29, 15 }
  0x50   : > { %v581_v23 = vmul.u32 2221713035, %v565_v7  ;;  %v579_v24 = vmul.u32 2221713035, %v563_v8  ;;  %v551_v1 = vshrl.u32 %v535_v30, 15  ;;  %v1710_v5 = vxor.u32 %v596_v50, %v580_v16 }
  0x51   : > { %v540_v3 = vmul.u32 2146121005, %v524_v39  ;;  %v541_v4 = vmul.u32 2146121005, %v525_v45  ;;  %v1712_v59 = vxor.u32 %v594_v53, %v578_v17  ;;  %v593_v60 = vshrl.u32 %v577_v44, 16 }
  0x52   : > { %v597_v52 = vshrl.u32 %v581_v23, 16  ;;  %v595_v58 = vshrl.u32 %v579_v24, 16  ;;  %v522_v7 = vxor.u32 %v506_v54, %v490_v36  ;;  %v607_v8 = vxor.u32 %v591_v55, %v575_v20 }
  0x53   : > { %v590_v11 = vshrl.u32 %v574_v56, 16  ;;  %v592_v14 = vshrl.u32 %v576_v57, 16  ;;  %v523_v15 = vxor.u32 %v507_v51, %v491_v35  ;;  %v584_v9 = vmul.u32 2221713035, %v568_v63 }
  0x54   : > { %v1714_v18 = vxor.u32 %v597_v52, %v581_v23  ;;  %v1716_v21 = vxor.u32 %v595_v58, %v579_v24  ;;  %v585_v10 = vmul.u32 2221713035, %v569_v42  ;;  %v1718_v28 = vxor.u32 %v550_v0, %v534_v29 }
  0x55   : > { %v1720_v16 = vxor.u32 %v551_v1, %v535_v30  ;;  %v556_v17 = vshrl.u32 %v540_v3, 15  ;;  %v557_v34 = vshrl.u32 %v541_v4, 15  ;;  %v609_v39 = vxor.u32 %v593_v60, %v577_v44 }
  0x56   : > { %v538_v35 = vmul.u32 2146121005, %v522_v7  ;;  %vm623_vm0 = vcmp.ge.u32.totalorder %v607_v8, 429496730  ;;  %v606_v23 = vxor.u32 %v590_v11, %v574_v56  ;;  %v608_v24 = vxor.u32 %v592_v14, %v576_v57 }
  0x57   : > { %v539_v45 = vmul.u32 2146121005, %v523_v15  ;;  %v600_v54 = vshrl.u32 %v584_v9, 16  ;;  %v601_v55 = vshrl.u32 %v585_v10, 16  ;;  %v582_v30 = vmul.u32 2221713035, %v1718_v28 }
  0x58   : > { %v583_v52 = vmul.u32 2221713035, %v1720_v16  ;;  %v1726_v58 = vxor.u32 %v556_v17, %v540_v3  ;;  %v1728_v63 = vxor.u32 %v557_v34, %v541_v4  ;;  %v554_v57 = vshrl.u32 %v538_v35, 15 }
  0x59   : > { %vm628_vm1 = vcmp.ge.u32.totalorder %v1710_v5, 429496730  ;;  %vm629_vm2 = vcmp.ge.u32.totalorder %v1714_v18, 429496730  ;;  %vm626_vm3 = vcmp.ge.u32.totalorder %v1712_v59, 429496730  ;;  %v1736_v60 = vxor.u32 %v600_v54, %v584_v9 }
  0x5a   : > { %vm627_vm4 = vcmp.ge.u32.totalorder %v1716_v21, 429496730  ;;  %vm625_vm5 = vcmp.ge.u32.totalorder %v609_v39, 429496730  ;;  %vm622_vm6 = vcmp.ge.u32.totalorder %v606_v23, 429496730  ;;  %v1738_v14 = vxor.u32 %v601_v55, %v585_v10 }
  0x5b   : > { %v555_v1 = vshrl.u32 %v539_v45, 15  ;;  %vm624_vm7 = vcmp.ge.u32.totalorder %v608_v24, 429496730  ;;  %v598_v15 = vshrl.u32 %v582_v30, 16  ;;  %v599_v17 = vshrl.u32 %v583_v52, 16 }
  0x5c   : > { %v1742_v34 = vxor.u32 %v554_v57, %v538_v35  ;;  %vm632_vm8 = vcmp.ge.u32.totalorder %v1736_v60, 429496730  ;;  %vm633_vm9 = vcmp.ge.u32.totalorder %v1738_v14, 429496730 }
  0x5d   : > { %v1746_v23 = vxor.u32 %v555_v1, %v539_v45  ;;  %v614_v24 = vxor.u32 %v598_v15, %v582_v30 }
  0x5e   : > { %v586_v26 = vmul.u32 2221713035, %v1742_v34 }
  0x5f   : > { %vm630_vm10 = vcmp.ge.u32.totalorder %v614_v24, 429496730 }
  0x9d   : > { %v408_v22 = vpop.permute.xlu1 %407  ;;  %v333_v27 = vpop.permute.xlu0 %332 }
  0x9e   : > { %v381_v36 = vmul.f32 %v1681_v19, %v333_v27  ;;  %v382_v20 = vmul.f32 %v1694_v47, %v333_v27  ;;  %v589_v27 = vmul.u32 2221713035, %v1728_v63 }
  0xa0   : > { %v445_v50 = vadd.f32 %v408_v22, %v381_v36  ;;  %v446_v53 = vadd.f32 %v408_v22, %v382_v20  ;;  %v588_v22 = vmul.u32 2221713035, %v1726_v58  ;;  %v605_v21 = vshrl.u32 %v589_v27, 16 }
  0xa1   : > { %v413_v29 = vpop.permute.xlu1 %412  ;;  %v338_v51 = vpop.permute.xlu0 %337 }
  0xa2   : > { %v461_v44 = vmax.f32 %v445_v50, 0.0  ;;  %v383_v42 = vmul.f32 %v1681_v19, %v338_v51  ;;  %v384_v56 = vmul.f32 %v1694_v47, %v338_v51  ;;  %v462_v0 = vmax.f32 %v446_v53, 0.0 }
  0xa3   : > { %v604_v8 = vshrl.u32 %v588_v22, 16 }
  0xa4   : > { %v447_v3 = vadd.f32 %v413_v29, %v383_v42  ;;  %v448_v4 = vadd.f32 %v413_v29, %v384_v56  ;;  %v638_v16 = vsel %vm622_vm6, %v461_v44, 0.0  ;;  %v639_v9 = vsel %vm623_vm0, %v462_v0, 0.0 }
  0xa5   : > { %v348_v7 = vpop.permute.xlu1 %347  ;;  %v343_v11 = vpop.permute.xlu0 %342  ;;  %v654_v51 = vmul.f32 1.1111112, %v638_v16  ;;  %v655_v0 = vmul.f32 1.1111112, %v639_v9  ;;  %vm726_vm0 = vcmask 523264  }
  0xa6   : > { %v463_v28 = vmax.f32 %v447_v3, 0.0  ;;  %v387_v36 = vmul.f32 %v1681_v19, %v348_v7  ;;  %v464_v20 = vmax.f32 %v448_v4, 0.0  ;;  %v388_v10 = vmul.f32 %v1694_v47, %v348_v7 }
  0xa7   : > { %v385_v50 = vmul.f32 %v1681_v19, %v343_v11  ;;  %v386_v53 = vmul.f32 %v1694_v47, %v343_v11 }
  0xa8   : > { %v640_v54 = vsel %vm624_vm7, %v463_v28, 0.0  ;;  %v641_v35 = vsel %vm625_vm5, %v464_v20, 0.0 }
  0xa9   : > { %v423_v55 = vpop.permute.xlu1 %422  ;;  %v418_v29 = vpop.permute.xlu0 %417  ;;  %v656_v44 = vmul.f32 1.1111112, %v640_v54  ;;  %v657_v1 = vmul.f32 1.1111112, %v641_v35  ;;  %v615_v54 = vxor.u32 %v599_v17, %v583_v52  ;;  %v602_v35 = vshrl.u32 %v586_v26, 16 }
  0xaa   : > { %v451_v42 = vadd.f32 %v423_v55, %v387_v36  ;;  %v452_v45 = vadd.f32 %v423_v55, %v388_v10  ;;  %v449_v56 = vadd.f32 %v418_v29, %v385_v50  ;;  %v450_v57 = vadd.f32 %v418_v29, %v386_v53 }
  0xab   : > { %v1269_v3 = vpack.c.bf16 %v656_v44, %v654_v51  ;;  %v1267_v20 = vpack.c.bf16 %v657_v1, %v655_v0  ;;  %v587_v36 = vmul.u32 2221713035, %v1746_v23  ;;  %vm631_vm11 = vcmp.ge.u32.totalorder %v615_v54, 429496730 }
  0xac   : > { %v467_v4 = vmax.f32 %v451_v42, 0.0  ;;  %v468_v7 = vmax.f32 %v452_v45, 0.0  ;;  %v465_v11 = vmax.f32 %v449_v56, 0.0  ;;  %v466_v39 = vmax.f32 %v450_v57, 0.0 }
  0xad   : > { %v358_v28 = vpop.permute.xlu1 %357  ;;  %v353_v16 = vpop.permute.xlu0 %352  ;;  %1268 = vmatprep.subr.bf16.mxu0 %v1267_v20  ;;  %v603_v51 = vshrl.u32 %v587_v36, 16 }
  0xae   : > { %v644_v9 = vsel %vm628_vm1, %v467_v4, 0.0  ;;  %v645_v10 = vsel %vm629_vm2, %v468_v7, 0.0  ;;  %v642_v30 = vsel %vm626_vm3, %v465_v11, 0.0  ;;  %v643_v15 = vsel %vm627_vm4, %v466_v39, 0.0  ;;  %1270 = vmatpush1.bf16.msra.mxu0 %v1269_v3 }
  0xaf   : > { %v660_v50 = vmul.f32 1.1111112, %v644_v9  ;;  %v661_v53 = vmul.f32 1.1111112, %v645_v10  ;;  %v658_v55 = vmul.f32 1.1111112, %v642_v30  ;;  %v391_v52 = vmul.f32 %v1681_v19, %v358_v28 }
  0xb0   : > { %v659_v17 = vmul.f32 1.1111112, %v643_v15  ;;  %v392_v34 = vmul.f32 %v1694_v47, %v358_v28  ;;  %v389_v5 = vmul.f32 %v1681_v19, %v353_v16  ;;  %v390_v18 = vmul.f32 %v1694_v47, %v353_v16 }
  0xb1   : > { %v433_v23 = vpop.permute.xlu1 %432  ;;  %v428_v59 = vpop.permute.xlu0 %427  ;;  %v1273_v29 = vpack.c.bf16 %v660_v50, %v658_v55  ;;  %v620_v39 = vxor.u32 %v604_v8, %v588_v22  ;;  %v621_v28 = vxor.u32 %v605_v21, %v589_v27  ;;  %v618_v16 = vxor.u32 %v602_v35, %v586_v26 }
  0xb2   : > { %v455_v44 = vadd.f32 %v433_v23, %v391_v52  ;;  %v456_v42 = vadd.f32 %v433_v23, %v392_v34  ;;  %v453_v45 = vadd.f32 %v428_v59, %v389_v5  ;;  %v454_v56 = vadd.f32 %v428_v59, %v390_v18 }
  0xb3   : > { %v1271_v57 = vpack.c.bf16 %v661_v53, %v659_v17  ;;  %v619_v20 = vxor.u32 %v603_v51, %v587_v36  ;;  %vm636_vm12 = vcmp.ge.u32.totalorder %v620_v39, 429496730  ;;  %vm637_vm13 = vcmp.ge.u32.totalorder %v621_v28, 429496730 }
  0xb4   : > { %v471_v0 = vmax.f32 %v455_v44, 0.0  ;;  %v472_v1 = vmax.f32 %v456_v42, 0.0  ;;  %v469_v3 = vmax.f32 %v453_v45, 0.0  ;;  %v470_v4 = vmax.f32 %v454_v56, 0.0  ;;  %v670_v56 = vld [vmem:[%s1979_s4] sm:$0xff] }
  0xb5   : > { %1272 = vmatprep.subr.bf16.mxu0 %v1271_v57  ;;  %v368_v7 = vpop.permute.xlu1 %367  ;;  %v363_v11 = vpop.permute.xlu0 %362  ;;  %vm634_vm14 = vcmp.ge.u32.totalorder %v618_v16, 429496730  ;;  %vm635_vm15 = vcmp.ge.u32.totalorder %v619_v20, 429496730  ;;  %v671_v57 = vld [vmem:[%s1979_s4 + $0x8] sm:$0xff]  ;;  %v1827_v39 = vstv %s1250_s10  ;;  %s1362_s10 = scalar_lea.vmem %s1361_s9, 64 }
  0xb6   : > { %v648_v9 = vsel %vm632_vm8, %v471_v0, 0.0  ;;  %v649_v10 = vsel %vm633_vm9, %v472_v1, 0.0  ;;  %v646_v30 = vsel %vm630_vm10, %v469_v3, 0.0  ;;  %v647_v15 = vsel %vm631_vm11, %v470_v4, 0.0  ;;  %1274 = vmatpush1.bf16.msra.mxu0 %v1273_v29  ;;  %v672_v0 = vld [vmem:[%s1979_s4 + $0x10] sm:$0xff]  ;;  %v673_v1 = vld [vmem:[%s1979_s4 + $0x18] sm:$0xff]  ;;  %p1364_p6 = scmp.lt.s32.totalorder %s1362_s10, %s1356_s30 }
  0xb7   : > { %v664_v50 = vmul.f32 1.1111112, %v648_v9  ;;  %v665_v53 = vmul.f32 1.1111112, %v649_v10  ;;  %v662_v58 = vmul.f32 1.1111112, %v646_v30  ;;  %v395_v22 = vmul.f32 %v1681_v19, %v368_v7 }
  0xb8   : > { %v663_v63 = vmul.f32 1.1111112, %v647_v15  ;;  %v396_v26 = vmul.f32 %v1694_v47, %v368_v7  ;;  %v393_v27 = vmul.f32 %v1681_v19, %v363_v11  ;;  %v394_v60 = vmul.f32 %v1694_v47, %v363_v11  ;;  %v674_v3 = vld [vmem:[%s1979_s4 + $0x20] sm:$0xff]  ;;  %v675_v4 = vld [vmem:[%s1979_s4 + $0x28] sm:$0xff]  ;;  %v676_v7 = vld [vmem:[%s1979_s4 + $0x30] sm:$0xff]  ;;  %p1365_p7 = por %p1364_p6, %p1363_p5 }
  0xb9   : > { %v443_v8 = vpop.permute.xlu1 %442  ;;  %v438_v14 = vpop.permute.xlu0 %437  ;;  %v1277_v24 = vpack.c.bf16 %v664_v50, %v662_v58  ;;  %v677_v11 = vld [vmem:[%s1979_s4 + $0x38] sm:$0xff]  ;;  %v881_v28 = vxor.u32 %v1827_v39, %v1642_v48  ;;  %v882_v16 = vxor.u32 %v1827_v39, %v1621_v40  ;;  %v883_v20 = vxor.u32 %v1827_v39, %v1645_v49 }
  0xba   : > { %v459_v36 = vadd.f32 %v443_v8, %v395_v22  ;;  %v460_v54 = vadd.f32 %v443_v8, %v396_v26  ;;  %v457_v55 = vadd.f32 %v438_v14, %v393_v27  ;;  %v458_v52 = vadd.f32 %v438_v14, %v394_v60  ;;  %p1366_p8 = pnand %p1365_p7, %p1359_p4 }
  0xbb   : > { %v1275_v17 = vpack.c.bf16 %v665_v53, %v663_v63  ;;  %v897_v9 = vshrl.u32 %v881_v28, 16  ;;  %v899_v10 = vshrl.u32 %v883_v20, 16  ;;  %v884_v30 = vxor.u32 %v1827_v39, %v1636_v46 }
  0xbc   : > { %v475_v34 = vmax.f32 %v459_v36, 0.0  ;;  %v476_v5 = vmax.f32 %v460_v54, 0.0  ;;  %v473_v18 = vmax.f32 %v457_v55, 0.0  ;;  %v474_v23 = vmax.f32 %v458_v52, 0.0 }
  0xbd   : > { %1276 = vmatprep.subr.bf16.mxu0 %v1275_v17  ;;  %v885_v15 = vxor.u32 %v1827_v39, %v1616_v38  ;;  %v886_v50 = vxor.u32 %v1827_v39, %v1629_v43  ;;  %v913_v53 = vxor.u32 %v897_v9, %v881_v28  ;;  %v887_v48 = vxor.u32 %v1827_v39, %v1613_v37 }
  0xbe   : > { %v652_v19 = vsel %vm636_vm12, %v475_v34, 0.0  ;;  %v653_v47 = vsel %vm637_vm13, %v476_v5, 0.0  ;;  %v650_v59 = vsel %vm634_vm14, %v473_v18, 0.0  ;;  %v651_v29 = vsel %vm635_vm15, %v474_v23, 0.0  ;;  %1278 = vmatpush1.bf16.msra.mxu0 %v1277_v24 }
  0xbf   : > { %v668_v21 = vmul.f32 1.1111112, %v652_v19  ;;  %v669_v35 = vmul.f32 1.1111112, %v653_v47  ;;  %v666_v51 = vmul.f32 1.1111112, %v650_v59  ;;  %v915_v58 = vxor.u32 %v899_v10, %v883_v20 }
  0xc0   : > { %v667_v44 = vmul.f32 1.1111112, %v651_v29  ;;  %v900_v22 = vshrl.u32 %v884_v30, 16  ;;  %v901_v49 = vshrl.u32 %v885_v15, 16  ;;  %v902_v63 = vshrl.u32 %v886_v50, 16 }
  0xc1   : > { %v1281_v42 = vpack.c.bf16 %v668_v21, %v666_v51  ;;  %v929_v26 = vmul.u32 2146121005, %v913_v53  ;;  %v888_v27 = vxor.u32 %v1827_v39, %v1624_v41  ;;  %v903_v46 = vshrl.u32 %v887_v48, 16 }
  0xc2   : > { %v1279_v45 = vpack.c.bf16 %v669_v35, %v667_v44  ;;  %v889_v38 = vxor.u32 %v1827_v39, %v1674_v12  ;;  %v931_v8 = vmul.u32 2146121005, %v915_v58  ;;  %v916_v43 = vxor.u32 %v900_v22, %v884_v30 }
  0xc3   : > { %v917_v14 = vxor.u32 %v901_v49, %v885_v15  ;;  %v918_v24 = vxor.u32 %v902_v63, %v886_v50  ;;  %v945_v36 = vshrl.u32 %v929_v26, 15  ;;  %v904_v37 = vshrl.u32 %v888_v27, 16 }
  0xc4   : > { %1280 = vmatprep.subr.bf16.mxu0 %v1279_v45  ;;  %v919_v54 = vxor.u32 %v903_v46, %v887_v48  ;;  %v905_v52 = vshrl.u32 %v889_v38, 16  ;;  %v890_v17 = vxor.u32 %v1827_v39, %v1677_v13  ;;  %v947_v34 = vshrl.u32 %v931_v8, 15 }
  0xc5   : > { %1282 = vmatpush1.bf16.msra.mxu0 %v1281_v42  ;;  %v932_v5 = vmul.u32 2146121005, %v916_v43  ;;  %v933_v41 = vmul.u32 2146121005, %v917_v14  ;;  %v961_v23 = vxor.u32 %v945_v36, %v929_v26  ;;  %v920_v19 = vxor.u32 %v904_v37, %v888_v27 }
  0xc6   : > { %v934_v18 = vmul.u32 2146121005, %v918_v24  ;;  %v935_v47 = vmul.u32 2146121005, %v919_v54  ;;  %v921_v59 = vxor.u32 %v905_v52, %v889_v38  ;;  %v906_v29 = vshrl.u32 %v890_v17, 16 }
  0xc7   : > { %v963_v21 = vxor.u32 %v947_v34, %v931_v8  ;;  %v948_v35 = vshrl.u32 %v932_v5, 15  ;;  %v891_v51 = vxor.u32 %v1827_v39, %v1659_v61  ;;  %v949_v44 = vshrl.u32 %v933_v41, 15 }
  0xc8   : > { %1252 = vmatmul.mubr.msk.f32.vlgmr.msra.gmra.mrb[0].mxu0 %vm726_vm0, %v670_v56  ;;  %v950_v42 = vshrl.u32 %v934_v18, 15  ;;  %v892_v13 = vxor.u32 %v1827_v39, %v1662_v62  ;;  %v977_v45 = vmul.u32 2221713035, %v961_v23  ;;  %v936_v56 = vmul.u32 2146121005, %v920_v19  ;;  %v689_v23 = vpop.permute.xlu0 %688 }
  0xc9   : > { %821 = vmatprep.mubr.f32.mxu0 %v1424_v25  ;;  %v965_v28 = vxor.u32 %v949_v44, %v933_v41  ;;  %v893_v48 = vxor.u32 %v1827_v39, %v1701_v2  ;;  %v894_v49 = vxor.u32 %v1827_v39, %v1704_v6  ;;  %v895_v27 = vxor.u32 %v1827_v39, %v1688_v32 }
  0xca   : > { %v908_v20 = vshrl.u32 %v892_v13, 16  ;;  %v993_v9 = vshrl.u32 %v977_v45, 16  ;;  %v896_v46 = vxor.u32 %v1827_v39, %v1691_v33 }
  0xcb   : > { %v909_v36 = vshrl.u32 %v893_v48, 16  ;;  %v911_v52 = vshrl.u32 %v895_v27, 16 }
  0xcc   : > { %1253 = vmatmul.mubr.msk.f32.gmra.mrb[2].mxu0 %vm726_vm0, %v671_v57  ;;  %v951_v57 = vshrl.u32 %v935_v47, 15  ;;  %v924_v22 = vxor.u32 %v908_v20, %v892_v13  ;;  %v1857_v63 = vxor.u32 %v993_v9, %v977_v45 }
  0xcd   : > { %827 = vmatprep.mubr.f32.mxu0 %v1424_v25  ;;  %v927_v44 = vxor.u32 %v911_v52, %v895_v27 }
  0xce   : > { %v967_v61 = vxor.u32 %v951_v57, %v935_v47  ;;  %v940_v54 = vmul.u32 2146121005, %v924_v22  ;;  %vm1025_vm1 = vcmp.ge.u32.totalorder %v1857_v63, 429496730 }
  0xd0   : > { %1254 = vmatmul.mubr.msk.f32.gmra.mrb[4].mxu0 %vm726_vm0, %v672_v0 }
  0xd1   : > { %833 = vmatprep.mubr.f32.mxu0 %v1424_v25 }
  0xd4   : > { %1255 = vmatmul.mubr.msk.f32.gmra.mrb[6].mxu0 %vm726_vm0, %v673_v1  ;;  %v937_v1 = vmul.u32 2146121005, %v921_v59  ;;  %v956_v59 = vshrl.u32 %v940_v54, 15 }
  0xd5   : > { %839 = vmatprep.mubr.f32.mxu0 %v1424_v25 }
  0xd6   : > { %v953_v30 = vshrl.u32 %v937_v1, 15 }
  0xd8   : > { %1256 = vmatmul.mubr.msk.f32.gmra.mrb[8].mxu0 %vm726_vm0, %v674_v3  ;;  %v922_v3 = vxor.u32 %v906_v29, %v890_v17  ;;  %v969_v8 = vxor.u32 %v953_v30, %v937_v1  ;;  %v912_v17 = vshrl.u32 %v896_v46, 16 }
  0xd9   : > { %845 = vmatprep.mubr.f32.mxu0 %v1424_v25 }
  0xda   : > { %v938_v15 = vmul.u32 2146121005, %v922_v3  ;;  %v985_v39 = vmul.u32 2221713035, %v969_v8 }
  0xdc   : > { %1257 = vmatmul.mubr.msk.f32.gmra.mrb[10].mxu0 %vm726_vm0, %v675_v4  ;;  %v979_v4 = vmul.u32 2221713035, %v963_v21  ;;  %v954_v2 = vshrl.u32 %v938_v15, 15 }
  0xdd   : > { %851 = vmatprep.mubr.f32.mxu0 %v1424_v25 }
  0xde   : > { %v995_v50 = vshrl.u32 %v979_v4, 16  ;;  %v1869_v34 = vxor.u32 %v954_v2, %v938_v15 }
  0xe0   : > { %1258 = vmatmul.mubr.msk.f32.gmra.mrb[12].mxu0 %vm726_vm0, %v676_v7  ;;  %v964_v7 = vxor.u32 %v948_v35, %v932_v5  ;;  %v1865_v43 = vxor.u32 %v995_v50, %v979_v4  ;;  %v986_v57 = vmul.u32 2221713035, %v1869_v34  ;;  %v694_v4 = vpop.permute.xlu1 %693 }
  0xe1   : > { %857 = vmatprep.mubr.f32.mxu0 %v1424_v25  ;;  %v898_v25 = vshrl.u32 %v882_v16, 16 }
  0xe2   : > { %v980_v62 = vmul.u32 2221713035, %v964_v7  ;;  %vm1027_vm3 = vcmp.ge.u32.totalorder %v1865_v43, 429496730  ;;  %v1002_v50 = vshrl.u32 %v986_v57, 16 }
  0xe3   : > { %v914_v40 = vxor.u32 %v898_v25, %v882_v16  ;;  %v966_v16 = vxor.u32 %v950_v42, %v934_v18  ;;  %v952_v25 = vshrl.u32 %v936_v56, 15  ;;  %v925_v18 = vxor.u32 %v909_v36, %v893_v48 }
  0xe4   : > { %1259 = vmatmul.mubr.msk.f32.gmra.mrb[14].mxu0 %vm726_vm0, %v677_v11  ;;  %v907_v11 = vshrl.u32 %v891_v51, 16  ;;  %v996_v14 = vshrl.u32 %v980_v62, 16  ;;  %v928_v42 = vxor.u32 %v912_v17, %v896_v46  ;;  %v704_v52 = vpop.permute.xlu1 %703 }
  0xe5   : > { %v930_v60 = vmul.u32 2146121005, %v914_v40  ;;  %v981_v40 = vmul.u32 2221713035, %v965_v28  ;;  %v968_v26 = vxor.u32 %v952_v25, %v936_v56  ;;  %v1001_v56 = vshrl.u32 %v985_v39, 16 }
  0xe6   : > { %v923_v53 = vxor.u32 %v907_v11, %v891_v51  ;;  %v982_v58 = vmul.u32 2221713035, %v966_v16  ;;  %v1012_v5 = vxor.u32 %v996_v14, %v980_v62  ;;  %v941_v3 = vmul.u32 2146121005, %v925_v18 }
  0xe7   : > { %v946_v55 = vshrl.u32 %v930_v60, 15  ;;  %v997_v6 = vshrl.u32 %v981_v40, 16  ;;  %v984_v32 = vmul.u32 2221713035, %v968_v26  ;;  %v1882_v28 = vxor.u32 %v956_v59, %v940_v54 }
  0xe8   : > { %v939_v24 = vmul.u32 2146121005, %v923_v53  ;;  %v998_v37 = vshrl.u32 %v982_v58, 16  ;;  %vm1028_vm4 = vcmp.ge.u32.totalorder %v1012_v5, 429496730  ;;  %v1888_v15 = vxor.u32 %v1001_v56, %v985_v39 }
  0xe9   : > { %v962_v12 = vxor.u32 %v946_v55, %v930_v60  ;;  %v983_v60 = vmul.u32 2221713035, %v967_v61  ;;  %v910_v55 = vshrl.u32 %v894_v49, 16  ;;  %v1872_v47 = vxor.u32 %v997_v6, %v981_v40 }
  0xea   : > { %v955_v41 = vshrl.u32 %v939_v24, 15  ;;  %v1000_v51 = vshrl.u32 %v984_v32, 16  ;;  %v943_v61 = vmul.u32 2146121005, %v927_v44  ;;  %v957_v40 = vshrl.u32 %v941_v3, 15 }
  0xeb   : > { %v978_v0 = vmul.u32 2221713035, %v962_v12  ;;  %v999_v33 = vshrl.u32 %v983_v60, 16  ;;  %v1874_v12 = vxor.u32 %v998_v37, %v982_v58  ;;  %v926_v29 = vxor.u32 %v910_v55, %v894_v49  ;;  %v699_v58 = vpop.permute.xlu0 %698 }
  0xec   : > { %v1879_v1 = vxor.u32 %v955_v41, %v939_v24  ;;  %vm1029_vm5 = vcmp.ge.u32.totalorder %v1872_v47, 429496730  ;;  %v1885_v25 = vxor.u32 %v1000_v51, %v984_v32  ;;  %v988_v27 = vmul.u32 2221713035, %v1882_v28 }
  0xed   : > { %v994_v10 = vshrl.u32 %v978_v0, 16  ;;  %v1876_v45 = vxor.u32 %v999_v33, %v983_v60  ;;  %v942_v16 = vmul.u32 2146121005, %v926_v29  ;;  %vm1030_vm6 = vcmp.ge.u32.totalorder %v1874_v12, 429496730 }
  0xee   : > { %v987_v48 = vmul.u32 2221713035, %v1879_v1  ;;  %v959_v63 = vshrl.u32 %v943_v61, 15  ;;  %vm1032_vm8 = vcmp.ge.u32.totalorder %v1885_v25, 429496730  ;;  %v1018_v29 = vxor.u32 %v1002_v50, %v986_v57  ;;  %v714_v50 = vpop.permute.xlu1 %713 }
  0xef   : > { %v1863_v38 = vxor.u32 %v994_v10, %v978_v0  ;;  %v944_v10 = vmul.u32 2146121005, %v928_v42  ;;  %vm1031_vm7 = vcmp.ge.u32.totalorder %v1876_v45, 429496730  ;;  %v958_v46 = vshrl.u32 %v942_v16, 15  ;;  %v709_v42 = vpop.permute.xlu0 %708 }
  0xf0   : > { %v1003_v43 = vshrl.u32 %v987_v48, 16  ;;  %vm1033_vm9 = vcmp.ge.u32.totalorder %v1888_v15, 429496730  ;;  %v1004_v51 = vshrl.u32 %v988_v27, 16  ;;  %vm1034_vm10 = vcmp.ge.u32.totalorder %v1018_v29, 429496730 }
  0xf1   : > { %vm1026_vm2 = vcmp.ge.u32.totalorder %v1863_v38, 429496730  ;;  %v960_v14 = vshrl.u32 %v944_v10, 15  ;;  %v1899_v38 = vxor.u32 %v957_v40, %v941_v3  ;;  %v1901_v34 = vxor.u32 %v958_v46, %v942_v16 }
  0xf2   : > { %v1019_v1 = vxor.u32 %v1003_v43, %v987_v48 }
  0xf3   : > { %v1903_v59 = vxor.u32 %v960_v14, %v944_v10  ;;  %v989_v44 = vmul.u32 2221713035, %v1899_v38  ;;  %v990_v3 = vmul.u32 2221713035, %v1901_v34  ;;  %v724_v34 = vpop.permute.xlu1 %723 }
  0xf4   : > { %vm1035_vm11 = vcmp.ge.u32.totalorder %v1019_v1, 429496730 }
 0x19b   : > { %v817_v19 = vpop.f32.mrb[0].mxu0 }
 0x19c   : > { %v818_v21 = vadd.f32 %v817_v19, %v689_v23  ;;  %v819_v35 = vpop.f32.mrb[1].mxu0  ;;  %v975_v19 = vxor.u32 %v959_v63, %v943_v61 }
 0x19d   : > { %v820_v13 = vadd.f32 %v819_v35, %v689_v23 }
 0x19e   : > { %v864_v0 = vmax.f32 %v818_v21, 0.0 }
 0x19f   : > { %v865_v7 = vmax.f32 %v820_v13, 0.0  ;;  %v823_v11 = vpop.f32.mrb[2].mxu0 }
 0x1a0   : > { %v824_v20 = vadd.f32 %v823_v11, %v694_v4  ;;  %v825_v9 = vpop.f32.mrb[3].mxu0  ;;  %v1041_v62 = vsel %vm1025_vm1, %v864_v0, 0.0  ;;  %v992_v11 = vmul.u32 2221713035, %v1903_v59 }
 0x1a1   : > { %v826_v30 = vadd.f32 %v825_v9, %v694_v4  ;;  %v1042_v26 = vsel %vm1026_vm2, %v865_v7, 0.0  ;;  %v1057_v24 = vmul.f32 1.1111112, %v1041_v62  ;;  %v991_v7 = vmul.u32 2221713035, %v975_v19 }
 0x1a2   : > { %v866_v53 = vmax.f32 %v824_v20, 0.0  ;;  %v1058_v55 = vmul.f32 1.1111112, %v1042_v26 }
 0x1a3   : > { %v867_v22 = vmax.f32 %v826_v30, 0.0  ;;  %v829_v49 = vpop.f32.mrb[4].mxu0  ;;  %v1020_v30 = vxor.u32 %v1004_v51, %v988_v27  ;;  %v1007_v26 = vshrl.u32 %v991_v7, 16  ;;  %v1008_v27 = vshrl.u32 %v992_v11, 16 }
 0x1a4   : > { %v1043_v60 = vsel %vm1027_vm3, %v866_v53, 0.0  ;;  %v830_v8 = vadd.f32 %v829_v49, %v699_v58  ;;  %v831_v2 = vpop.f32.mrb[5].mxu0  ;;  %v1005_v53 = vshrl.u32 %v989_v44, 16  ;;  %v1006_v49 = vshrl.u32 %v990_v3, 16 }
 0x1a5   : > { %v1059_v36 = vmul.f32 1.1111112, %v1043_v60  ;;  %v832_v6 = vadd.f32 %v831_v2, %v699_v58  ;;  %v1044_v37 = vsel %vm1028_vm4, %v867_v22, 0.0  ;;  %vm1036_vm12 = vcmp.ge.u32.totalorder %v1020_v30, 429496730 }
 0x1a6   : > { %v868_v54 = vmax.f32 %v830_v8, 0.0  ;;  %v1060_v32 = vmul.f32 1.1111112, %v1044_v37  ;;  %v719_v8 = vpop.permute.xlu0 %718  ;;  %v1024_v43 = vxor.u32 %v1008_v27, %v992_v11 }
 0x1a7   : > { %v869_v17 = vmax.f32 %v832_v6, 0.0  ;;  %v835_v33 = vpop.f32.mrb[6].mxu0  ;;  %v1285_v39 = vpack.c.bf16 %v1059_v36, %v1057_v24  ;;  %v1021_v24 = vxor.u32 %v1005_v53, %v989_v44 }
 0x1a8   : > { %v836_v41 = vadd.f32 %v835_v33, %v704_v52  ;;  %v837_v18 = vpop.f32.mrb[7].mxu0  ;;  %v1283_v23 = vpack.c.bf16 %v1060_v32, %v1058_v55  ;;  %v1045_v21 = vsel %vm1029_vm5, %v868_v54, 0.0  ;;  %v1022_v54 = vxor.u32 %v1006_v49, %v990_v3 }
 0x1a9   : > { %v838_v5 = vadd.f32 %v837_v18, %v704_v52  ;;  %v1046_v13 = vsel %vm1030_vm6, %v869_v17, 0.0  ;;  %v1061_v28 = vmul.f32 1.1111112, %v1045_v21  ;;  %v1023_v55 = vxor.u32 %v1007_v26, %v991_v7 }
 0x1aa   : > { %v870_v35 = vmax.f32 %v836_v41, 0.0  ;;  %1284 = vmatprep.subr.bf16.mxu1 %v1283_v23  ;;  %v1062_v9 = vmul.f32 1.1111112, %v1046_v13  ;;  %vm1037_vm13 = vcmp.ge.u32.totalorder %v1021_v24, 429496730 }
 0x1ab   : > { %v871_v56 = vmax.f32 %v838_v5, 0.0  ;;  %v841_v0 = vpop.f32.mrb[8].mxu0  ;;  %1286 = vmatpush1.bf16.msra.mxu1 %v1285_v39  ;;  %vm1038_vm14 = vcmp.ge.u32.totalorder %v1022_v54, 429496730  ;;  %vm1039_vm15 = vcmp.ge.u32.totalorder %v1023_v55, 429496730 }
 0x1ac   : > { %v1047_v57 = vsel %vm1031_vm7, %v870_v35, 0.0  ;;  %v842_v47 = vadd.f32 %v841_v0, %v709_v42  ;;  %v843_v4 = vpop.f32.mrb[9].mxu0  ;;  %vm1040_vm1 = vcmp.ge.u32.totalorder %v1024_v43, 429496730  ;;  %v1425_v7 = vmov 1966171168  }
 0x1ad   : > { %v1063_v16 = vmul.f32 1.1111112, %v1047_v57  ;;  %v1048_v12 = vsel %vm1032_vm8, %v871_v56, 0.0  ;;  %v844_v20 = vadd.f32 %v843_v4, %v709_v42  ;;  %v1073_v4 = vld [vmem:[%s1981_s6] sm:$0x1]  ;;  %v1154_v11 = vunpack.c.l.s4 %v1425_v7 }
 0x1ae   : > { %v1064_v61 = vmul.f32 1.1111112, %v1048_v12  ;;  %v872_v10 = vmax.f32 %v842_v47, 0.0 }
 0x1af   : > { %v873_v62 = vmax.f32 %v844_v20, 0.0  ;;  %v847_v45 = vpop.f32.mrb[10].mxu0  ;;  %v1289_v48 = vpack.c.bf16 %v1063_v16, %v1061_v28  ;;  %v1075_v28 = vstv %s1074_s17  ;;  %v1155_v16 = vunpack.c.0.s8 %v1154_v11 }
 0x1b0   : > { %v848_v40 = vadd.f32 %v847_v45, %v714_v50  ;;  %v849_v58 = vpop.f32.mrb[11].mxu0  ;;  %v1287_v22 = vpack.c.bf16 %v1064_v61, %v1062_v9  ;;  %v1049_v25 = vsel %vm1033_vm9, %v872_v10, 0.0 }
 0x1b1   : > { %v850_v46 = vadd.f32 %v849_v58, %v714_v50  ;;  %v1050_v2 = vsel %vm1034_vm10, %v873_v62, 0.0  ;;  %v1065_v32 = vmul.f32 1.1111112, %v1049_v25  ;;  %v1158_v10 = vsub.s32 %v1155_v16, %v1603_v31 }
 0x1b2   : > { %v874_v60 = vmax.f32 %v848_v40, 0.0  ;;  %1288 = vmatprep.subr.bf16.mxu1 %v1287_v22  ;;  %v1066_v17 = vmul.f32 1.1111112, %v1050_v2  ;;  %v1987_v62 = vlaneseq }
 0x1b3   : > { %v875_v63 = vmax.f32 %v850_v46, 0.0  ;;  %v853_v14 = vpop.f32.mrb[12].mxu0  ;;  %1290 = vmatpush1.bf16.msra.mxu1 %v1289_v48 }
 0x1b4   : > { %v1051_v36 = vsel %vm1035_vm11, %v874_v60, 0.0  ;;  %v854_v6 = vadd.f32 %v853_v14, %v719_v8  ;;  %v855_v37 = vpop.f32.mrb[13].mxu0 }
 0x1b5   : > { %v1067_v38 = vmul.f32 1.1111112, %v1051_v36  ;;  %v1052_v15 = vsel %vm1036_vm12, %v875_v63, 0.0  ;;  %v856_v52 = vadd.f32 %v855_v37, %v719_v8 }
 0x1b6   : > { %v1068_v33 = vmul.f32 1.1111112, %v1052_v15  ;;  %v876_v39 = vmax.f32 %v854_v6, 0.0 }
 0x1b7   : > { %v877_v41 = vmax.f32 %v856_v52, 0.0  ;;  %v859_v18 = vpop.f32.mrb[14].mxu0  ;;  %v1293_v23 = vpack.c.bf16 %v1067_v38, %v1065_v32 }
 0x1b8   : > { %v860_v19 = vadd.f32 %v859_v18, %v724_v34  ;;  %v861_v59 = vpop.f32.mrb[15].mxu0  ;;  %v1291_v5 = vpack.c.bf16 %v1068_v33, %v1066_v17  ;;  %v1053_v21 = vsel %vm1037_vm13, %v876_v39, 0.0 }
 0x1b9   : > { %v862_v29 = vadd.f32 %v861_v59, %v724_v34  ;;  %v1054_v51 = vsel %vm1038_vm14, %v877_v41, 0.0  ;;  %v1069_v13 = vmul.f32 1.1111112, %v1053_v21 }
 0x1ba   : > { %v878_v35 = vmax.f32 %v860_v19, 0.0  ;;  %1292 = vmatprep.subr.bf16.mxu1 %v1291_v5  ;;  %v1070_v1 = vmul.f32 1.1111112, %v1054_v51 }
 0x1bb   : > { %v879_v44 = vmax.f32 %v862_v29, 0.0  ;;  %1294 = vmatpush1.bf16.msra.mxu1 %v1293_v23 }
 0x1bc   : > { %v1055_v42 = vsel %vm1039_vm15, %v878_v35, 0.0 }
 0x1bd   : > { %v1071_v56 = vmul.f32 1.1111112, %v1055_v42  ;;  %v1056_v0 = vsel %vm1040_vm1, %v879_v44, 0.0 }
 0x1be   : > { %v1072_v3 = vmul.f32 1.1111112, %v1056_v0 }
 0x1bf   : > { %v1297_v57 = vpack.c.bf16 %v1071_v56, %v1069_v13 }
 0x1c0   : > { %v1295_v47 = vpack.c.bf16 %v1072_v3, %v1070_v1 }
 0x1c2   : > { %1296 = vmatprep.subr.bf16.mxu1 %v1295_v47 }
 0x1c3   : > { %1298 = vmatpush1.bf16.msra.mxu1 %v1297_v57 }
 0x1c6   : > { %1260 = vmatmul.mubr.msk.f32.vlgmr.msra.gmra.mrb[0].mxu1 %vm726_vm0, %v1073_v4  ;;  %vm1170_vm0 = vcmp.lt.s32.totalorder %v1987_v62, 256 }
 0x299   : > { %v1145_v12 = vpop.f32.mrb[0].mxu1 }
 0x29a   : > { %v1146_v20 = vadd.f32 %v1145_v12, %v1075_v28  ;;  %v1147_v9 = vpop.f32.mrb[1].mxu1 }
 0x29b   : > { %v1148_v61 = vadd.f32 %v1147_v9, %v1075_v28 }
 0x29d   : > { %v1152_v30 = vcombine.low %v1146_v20, %v1148_v61 }
 0x29f   : > { %v1159_v50 = vrot.slane %v1152_v30, %v1158_v10 }
 0x2a1   : > { %v1166_v45 = vrot.slane %v1159_v50, %v1158_v10 }
 0x2a3   : > { %1172 = vst.msk [vmem:[%s278_s24] sm:$0x3] %vm1170_vm0, %v1166_v45 }
 0x2a4   : > { %1369 = shalt.err (!%p1366_p8)
}
 0x2a5   : > { %s1370_s11 = scalar_lea.hbm %s1933_s28, 32  ;;  %s1374_s18 = scalar_lea.hbm %s1983_s8, 64 }
 0x2a6   : > { %p1371_p9 = scmp.ne.s32.totalorder %s1933_s28, %s1370_s11  ;;  %p1375_p0 = scmp.lt.u32.totalorder %s1933_s28, %s1983_s8 }
 0x2a7   : > { %p1376_p1 = scmp.lt.u32.totalorder %s1374_s18, %s1370_s11  ;;  %p1378_p3 = scmp.lt.u32.totalorder %s1370_s11, %s1933_s28 }
 0x2a8   : > { %p1372_p12 = pnand %p1371_p9, %p1516_p10 }
 0x2a9   : > { %p1377_p2 = por %p1376_p1, %p1375_p0 }
 0x2aa   : > { %p1373_p13 = pneg %p1372_p12 }
 0x2ab   : > { %p1379_p4 = por %p1378_p3, %p1377_p2 }
 0x2ad   : > { %p1380_p5 = pnand %p1379_p4, %p1373_p13 }
 0x2af   : > { %1383 = shalt.err (!%p1380_p5)
}
 0x2b0   : > { %1299 = dma.vmem_to_hbm [thread:$0]  (%p1516_p10), %s1935_s25, 32, %s1933_s28, %s1174_s29  }
 0x2b1 PF: > { %p1305_p6 = scmp.ge.s32.totalorder %s1420_s13, 2  ;;  %s1200_s24 = sand.u32 1, %s1408_s0  }
 0x2b2   : > { %s1201_s26 = scalar_lea.sflag [#allocation6], %s1200_s24 }
 0x2b3   : > { %p1302_p7 = pnand %p1305_p6, %p1520_p11 }
 0x2b5   : > { %1403 = dma.done.wait (!%p1302_p7), %s1201_s26, 32  }
 0x2b6   : > { %1405 = vsyncadd (!%p1302_p7), %s1201_s26, 4294967264  ;;  %p25_p8 = scmp.ge.s32.totalorder %s1503_s16, 4   ;;  %s1988_s0 = smov %s1412_s12 }
 0x2b7   : > { %s1989_s12 = smov %s1416_s7  ;;  %s1990_s7 = smov %s1514_s19 }
 0x2b8   : > { %s1991_s13 = smov %s1503_s16  ;;  %27 = sbr.rel (!%p25_p8) target bundleno = 18 (0x12), region = 83 }
 0x2bf   :  { %1206 = vsyncpa [#allocation6], 1 }
 0x2c0   :  { %1208 = vsyncpa [#allocation6 + $0x1], 1 }

</bundles_post_ra>
